<compile_context>
chip_gen: v6e
topology: v6e:2x2x1
jax: 0.10.0
libtpu: 0.0.40
codegen_flags: <defaults>
</compile_context>

<pallas_src>
import functools

import numpy as np
import jax
import jax.numpy as jnp
from jax.experimental import pallas as pl
from jax.experimental.pallas import tpu as pltpu

_A = -0.75                      # PyTorch bicubic kernel coefficient
_COMPUTE_DTYPE = jnp.bfloat16   # MXU-native operand dtype on v5e / v6e / v7x
_MAX_SLABS_PER_BLOCK = 16       # cap on the statically unrolled per-block matmul loop


def _cubic_conv1(x):  # |x| in [0, 1]
    return ((_A + 2.0) * x - (_A + 3.0)) * x * x + 1.0


def _cubic_conv2(x):  # |x| in [1, 2]
    return ((_A * x - 5.0 * _A) * x + 8.0 * _A) * x - 4.0 * _A


def _build_warp_matrix(T, center, warped, warp_length):
    """Dense (T, T) matrix for the piecewise bicubic time warp, built on device.

    center / warped / warp_length may be traced int scalars: the matrix shape stays
    (T, T), so there is no per-step recompile and no device->host sync.  Rows match
    PyTorch F.interpolate(mode='bicubic', align_corners=False) with border-clamped
    taps, applied separately to [0, center) -> [0, warped) and
    [center, warp_length) -> [warped, warp_length); rows >= warp_length are identity.
    Built in f32 (tap placement relies on exact integer equality; exact for T < 2^24)
    and cast to the bf16 compute dtype afterwards.
    """
    center_f = jnp.asarray(center, jnp.float32)
    warped_f = jnp.asarray(warped, jnp.float32)
    wl_f = jnp.asarray(warp_length, jnp.float32)

    rows = jnp.arange(T, dtype=jnp.float32)            # (T,)
    cols = jnp.arange(T, dtype=jnp.float32)[None, :]   # (1, T)

    is_left = rows < warped_f
    is_tail = rows >= wl_f

    # left segment : in_size=center,           out rows [0, warped),        col offset 0
    # right segment: in_size=warp_len-center,  out rows [warped, warp_len), col offset center
    in_size = jnp.where(is_left, center_f, wl_f - center_f)
    out_size = jnp.where(is_left, warped_f, wl_f - warped_f)
    col_off = jnp.where(is_left, 0.0, center_f)
    local_row = jnp.where(is_left, rows, rows - warped_f)

    src = in_size / out_size * (local_row + 0.5) - 0.5
    i0 = jnp.floor(src)
    t = src - i0
    coeffs = jnp.stack(
        [_cubic_conv2(t + 1.0), _cubic_conv1(t),
         _cubic_conv1(1.0 - t), _cubic_conv2(2.0 - t)], axis=-1)   # (T, 4)

    W = jnp.zeros((T, T), jnp.float32)
    for k in range(4):
        # Tap column indices (exact small integers in f32); duplicates from the border
        # clamp accumulate, matching "W[i, idx] += c" semantics.
        idx = jnp.clip(i0 - 1.0 + k, 0.0, in_size - 1.0) + col_off
        W = W + coeffs[:, k][:, None] * (cols == idx[:, None]).astype(jnp.float32)

    ident = (cols == rows[:, None]).astype(jnp.float32)
    return jnp.where(is_tail[:, None], ident, W)


def _warp_slab_kernel(w_ref, x_ref, o_ref, *, k_slabs):
    # w_ref: (T, T) warp matrix in the bf16 compute dtype (constant block index, so
    #        it is DMA'd once per core and stays resident).
    # x_ref / o_ref: (k_slabs, T, F) blocks of the (B*C, T, F) spectrogram.
    w = w_ref[...]
    for s in range(k_slabs):                       # short static unroll
        xs = x_ref[s].astype(w.dtype)              # VPU cast; HBM traffic stays x.dtype
        ys = jnp.dot(w, xs, preferred_element_type=jnp.float32)
        o_ref[s] = ys.astype(o_ref.dtype)


def _vmem_budget_bytes():
    # Per-generation budget: ~85% of physical VMEM (v7x: 64 MiB/TC -> ~54 MiB,
    # v5e/v6e: 128 MiB -> capped at 100 MiB), with a conservative fallback.
    try:
        cap = int(pltpu.get_tpu_info().vmem_capacity_bytes)
    except Exception:
        cap = 64 << 20
    return min(int(cap * 0.85), 100 << 20)


def _choose_slabs_per_block(BC, T, F, in_itemsize, out_itemsize, w_bytes, budget):
    # Double-buffered x and y blocks + (auto-pipeline double-buffered) W must fit.
    per_slab = 2 * T * F * (in_itemsize + out_itemsize)
    avail = budget - 2 * w_bytes - (2 << 20)
    k = max(1, avail // per_slab) if avail > 0 else 1
    k = min(k, _MAX_SLABS_PER_BLOCK)
    # Keep >= 2 grid steps when possible so both v7x TensorCores get work
    # (the B*C axis is marked "parallel").
    if BC > 1:
        k = min(k, (BC + 1) // 2)
    return max(1, min(k, BC))


def _apply_warp(x_bctf, W):
    """y[b, c] = W @ x[b, c] for every (b, c), gridded over (B*C, T, F) slab blocks."""
    B, C, T, F = x_bctf.shape
    BC = B * C
    x3d = x_bctf.reshape(BC, T, F)                 # free reshape: no HBM shuffle
    Wc = W.astype(_COMPUTE_DTYPE)                  # bf16 MXU operand, built once

    in_itemsize = jnp.dtype(x_bctf.dtype).itemsize
    out_itemsize = in_itemsize
    w_bytes = T * T * jnp.dtype(_COMPUTE_DTYPE).itemsize
    budget = _vmem_budget_bytes()
    k = _choose_slabs_per_block(BC, T, F, in_itemsize, out_itemsize, w_bytes, budget)
    grid_n = pl.cdiv(BC, k)                        # partial edge block masked by Pallas

    vmem_need = 2 * w_bytes + 2 * k * T * F * (in_itemsize + out_itemsize) + (2 << 20)
    vmem_limit = int(min(max(vmem_need, 16 << 20), budget))
    cost = pl.CostEstimate(
        flops=2 * T * T * F * BC,
        transcendentals=0,
        bytes_accessed=w_bytes + BC * T * F * (in_itemsize + out_itemsize),
    )
    # TODO(synk): for very large T, W has only 4 non-zeros per row (+ identity tail);
    # a scalar-prefetch band/gather kernel (O(4*T*N) VPU work, no O(T^2) W residency)
    # beats this dense MXU matmul — lowest crossover on v5e and on v7x (64 MiB VMEM).
    # TODO(synk): W is still double-buffered by the auto-pipeline (constant block
    # index); single-buffering it would free T*T*2 bytes of VMEM for larger slabs.
    # TODO(synk): T that is not an MXU-tile multiple costs partially filled MXU
    # passes; padding x/y along T would add full HBM pad/slice passes, so it is
    # deliberately not done here (memory-bound regime).

    out3d = pl.pallas_call(
        functools.partial(_warp_slab_kernel, k_slabs=k),
        out_shape=jax.ShapeDtypeStruct((BC, T, F), x_bctf.dtype),
        grid=(grid_n,),
        in_specs=[
            pl.BlockSpec((T, T), lambda j: (0, 0)),        # resident warp matrix
            pl.BlockSpec((k, T, F), lambda j: (j, 0, 0)),  # k spectrogram slabs
        ],
        out_specs=pl.BlockSpec((k, T, F), lambda j: (j, 0, 0)),
        compiler_params=pltpu.CompilerParams(
            dimension_semantics=("parallel",),
            vmem_limit_bytes=vmem_limit,
        ),
        cost_estimate=cost,
    )(Wc, x3d)
    return out3d.reshape(B, C, T, F)


def spec_warper_forward(x, key, window=80, mode="bicubic", dim=-2,
                        x_lengths=None, training=True):
    """JAX/Pallas equivalent of SpecWarper.forward (fully traceable / jittable)."""
    if not training:
        return x
    if mode != "bicubic":
        # TODO(synk): only the default 'bicubic' interpolation weights are implemented.
        raise NotImplementedError("only mode='bicubic' is implemented")

    in_shape = x.shape
    ndim = x.ndim
    if ndim == 3:
        x = x[:, None, :, :]
    # Replicates the original PyTorch dim remapping exactly (including its quirk that
    # a positive dim never reaches the swap-axes path).
    if dim > 0:
        dim = ndim - dim
    if dim == -1:
        # TODO(synk): the dim=-1 (freq-warp) path keeps the module's explicit swapaxes;
        # a right-multiply (x @ W^T) kernel variant would remove these two HBM transposes.
        x = jnp.swapaxes(x, -1, -2)

    T = x.shape[-2]
    if dim == -1 or x_lengths is None:
        warp_length = jnp.asarray(T, jnp.int32)
    else:
        # PyTorch: int(x.shape[-2] * torch.min(x_lengths)); x_lengths are fractional
        # lengths in [0, 1].  Kept as a traced scalar to avoid a device->host sync.
        warp_length = (T * jnp.min(x_lengths)).astype(jnp.int32)

    # torch.randint(low, high) has an exclusive high; jax.random.randint matches.
    # PyTorch raises on an empty range (warp_length <= 2*window); under jit we clamp
    # the bounds so the traced sampler always yields a well-defined warp.  The clamps
    # are no-ops whenever the original range is valid.
    k1, k2 = jax.random.split(key)
    hi = jnp.maximum(warp_length - window, window + 1)
    center = jax.random.randint(k1, (), window, hi)
    center = jnp.clip(center, 1, warp_length - 1)
    warped = jax.random.randint(k2, (), center - window, center + window) + 1
    warped = jnp.clip(warped, 1, warp_length - 1)

    W = _build_warp_matrix(T, center, warped, warp_length)
    y = _apply_warp(x, W)

    if dim == -1:
        y = jnp.swapaxes(y, -1, -2)
    return y.reshape(in_shape)


def _build_warp_matrix_host(T, center, warped, warp_length):
    """float64 host reference of the same warp matrix (test only)."""
    W = np.zeros((T, T), dtype=np.float64)

    def fill(out0, out_size, in0, in_size):
        scale = in_size / out_size
        for i in range(out_size):
            src = scale * (i + 0.5) - 0.5
            i0 = int(np.floor(src))
            t = src - i0
            cs = (_cubic_conv2(t + 1.0), _cubic_conv1(t),
                  _cubic_conv1(1.0 - t), _cubic_conv2(2.0 - t))
            for k in range(4):
                idx = min(max(i0 - 1 + k, 0), in_size - 1)
                W[out0 + i, in0 + idx] += cs[k]

    fill(0, warped, 0, center)
    fill(warped, warp_length - warped, center, warp_length - center)
    for i in range(warp_length, T):
        W[i, i] = 1.0
    return W


if __name__ == "__main__":
    key = jax.random.PRNGKey(0)
    kx, kw, kx2 = jax.random.split(key, 3)

    # (batch, channels, time, freq); freq kept lane-dense (multiple of 128) and the
    # window shrunk so randint(window, T - window) has a valid range at T = 16.
    B, C, T, F = 2, 4, 16, 128
    x = jax.random.normal(kx, (B, C, T, F), dtype=jnp.float32)

    fwd = jax.jit(spec_warper_forward,
                  static_argnames=("window", "mode", "dim", "training"))
    y = fwd(x, kw, window=4, mode="bicubic", dim=-2, training=True)
    jax.block_until_ready(y)
    assert y.shape == x.shape and y.dtype == x.dtype

    # Reproduce the warp parameters sampled inside the forward (same key splits;
    # the in-forward clamps are no-ops for this valid configuration).
    k1, k2 = jax.random.split(kw)
    center = jax.random.randint(k1, (), 4, T - 4)
    warped = jax.random.randint(k2, (), center - 4, center + 4) + 1

    # 1) Pallas kernel (bf16 MXU operands, f32 accumulation) vs a pure reference with
    #    the same device-built W.
    W_dev = _build_warp_matrix(T, center, warped, T)
    y_ref = np.einsum("ts,bcsf->bctf", np.asarray(W_dev), np.asarray(x))
    np.testing.assert_allclose(np.asarray(y), y_ref, rtol=2e-2, atol=2e-2)

    # 2) On-device W build vs float64 host bicubic reference (output-level compare).
    W_host = _build_warp_matrix_host(T, int(center), int(warped), T)
    y_ref64 = np.einsum("ts,bcsf->bctf", W_host, np.asarray(x, np.float64))
    np.testing.assert_allclose(np.asarray(y), y_ref64, rtol=2e-2, atol=2e-2)

    # 3) Bicubic taps are a partition of unity: every warp-matrix row sums to 1.
    np.testing.assert_allclose(np.asarray(W_dev).sum(axis=1), 1.0, rtol=1e-5, atol=1e-5)

    # 4) Shape whose B*C is not a multiple of the slab count: exercises the pl.cdiv
    #    grid with a masked partial edge block.
    x2 = jax.random.normal(kx2, (3, 1, T, F), dtype=jnp.float32)
    y2 = fwd(x2, kw, window=4, mode="bicubic", dim=-2, training=True)
    jax.block_until_ready(y2)
    y2_ref = np.einsum("ts,bcsf->bctf", np.asarray(W_dev), np.asarray(x2))
    np.testing.assert_allclose(np.asarray(y2), y2_ref, rtol=2e-2, atol=2e-2)

    print("KERNEL_OK")
</pallas_src>

<mosaic_0001>
module attributes {stable_mosaic.version = 11 : i64} {
  func.func @_warp_slab_kernel(%arg0: i32, %arg1: memref<16x16xbf16, #tpu.memory_space<vmem>>, %arg2: memref<4x16x128xf32, #tpu.memory_space<vmem>>, %arg3: memref<4x16x128xf32, #tpu.memory_space<vmem>>) attributes {dimension_semantics = [#tpu.dimension_semantics<parallel>], iteration_bounds = array<i64: 2>, scalar_prefetch = 0 : i64, scratch_operands = 0 : i64, tpu.core_type = #tpu.core_type<tc>, window_params = [{pipeline_mode = #tpu.pipeline_mode<synchronous>, transform_indices = @transform_0, window_bounds = array<i64: 16, 16>}, {transform_indices = @transform_1, window_bounds = array<i64: 4, 16, 128>}, {transform_indices = @transform_2, window_bounds = array<i64: 4, 16, 128>}]} {
    %c0 = arith.constant 0 : index
    %c0_0 = arith.constant 0 : index
    %0 = vector.load %arg1[%c0, %c0_0] : memref<16x16xbf16, #tpu.memory_space<vmem>>, vector<16x16xbf16>
    %c0_1 = arith.constant 0 : index
    %c0_2 = arith.constant 0 : index
    %c0_3 = arith.constant 0 : index
    %1 = vector.load %arg2[%c0_1, %c0_2, %c0_3] : memref<4x16x128xf32, #tpu.memory_space<vmem>>, vector<1x16x128xf32>
    %2 = vector.shape_cast %1 : vector<1x16x128xf32> to vector<16x128xf32>
    %3 = arith.truncf %2 : vector<16x128xf32> to vector<16x128xbf16>
    %cst = arith.constant dense<0.000000e+00> : vector<16x128xf32>
    %4 = tpu.matmul %0, %3, %cst {dimension_numbers = #tpu.dot_dimension_numbers<[1], [0], [0], [1], [0, 0, 1, 1], [], []>} : vector<16x16xbf16>, vector<16x128xbf16>, vector<16x128xf32> -> vector<16x128xf32>
    %c0_4 = arith.constant 0 : index
    %c0_5 = arith.constant 0 : index
    %c0_6 = arith.constant 0 : index
    %5 = vector.load %arg3[%c0_4, %c0_5, %c0_6] : memref<4x16x128xf32, #tpu.memory_space<vmem>>, vector<1x16x128xf32>
    %6 = vector.shape_cast %5 : vector<1x16x128xf32> to vector<16x128xf32>
    %7 = vector.shape_cast %4 : vector<16x128xf32> to vector<1x16x128xf32>
    tpu.vector_store %arg3[%c0_4, %c0_5, %c0_6], %7 {strides = array<i32>} : memref<4x16x128xf32, #tpu.memory_space<vmem>>, vector<1x16x128xf32>,
    %c1 = arith.constant 1 : index
    %c0_7 = arith.constant 0 : index
    %c0_8 = arith.constant 0 : index
    %8 = vector.load %arg2[%c1, %c0_7, %c0_8] : memref<4x16x128xf32, #tpu.memory_space<vmem>>, vector<1x16x128xf32>
    %9 = vector.shape_cast %8 : vector<1x16x128xf32> to vector<16x128xf32>
    %10 = arith.truncf %9 : vector<16x128xf32> to vector<16x128xbf16>
    %cst_9 = arith.constant dense<0.000000e+00> : vector<16x128xf32>
    %11 = tpu.matmul %0, %10, %cst_9 {dimension_numbers = #tpu.dot_dimension_numbers<[1], [0], [0], [1], [0, 0, 1, 1], [], []>} : vector<16x16xbf16>, vector<16x128xbf16>, vector<16x128xf32> -> vector<16x128xf32>
    %c1_10 = arith.constant 1 : index
    %c0_11 = arith.constant 0 : index
    %c0_12 = arith.constant 0 : index
    %12 = vector.load %arg3[%c1_10, %c0_11, %c0_12] : memref<4x16x128xf32, #tpu.memory_space<vmem>>, vector<1x16x128xf32>
    %13 = vector.shape_cast %12 : vector<1x16x128xf32> to vector<16x128xf32>
    %14 = vector.shape_cast %11 : vector<16x128xf32> to vector<1x16x128xf32>
    tpu.vector_store %arg3[%c1_10, %c0_11, %c0_12], %14 {strides = array<i32>} : memref<4x16x128xf32, #tpu.memory_space<vmem>>, vector<1x16x128xf32>,
    %c2 = arith.constant 2 : index
    %c0_13 = arith.constant 0 : index
    %c0_14 = arith.constant 0 : index
    %15 = vector.load %arg2[%c2, %c0_13, %c0_14] : memref<4x16x128xf32, #tpu.memory_space<vmem>>, vector<1x16x128xf32>
    %16 = vector.shape_cast %15 : vector<1x16x128xf32> to vector<16x128xf32>
    %17 = arith.truncf %16 : vector<16x128xf32> to vector<16x128xbf16>
    %cst_15 = arith.constant dense<0.000000e+00> : vector<16x128xf32>
    %18 = tpu.matmul %0, %17, %cst_15 {dimension_numbers = #tpu.dot_dimension_numbers<[1], [0], [0], [1], [0, 0, 1, 1], [], []>} : vector<16x16xbf16>, vector<16x128xbf16>, vector<16x128xf32> -> vector<16x128xf32>
    %c2_16 = arith.constant 2 : index
    %c0_17 = arith.constant 0 : index
    %c0_18 = arith.constant 0 : index
    %19 = vector.load %arg3[%c2_16, %c0_17, %c0_18] : memref<4x16x128xf32, #tpu.memory_space<vmem>>, vector<1x16x128xf32>
    %20 = vector.shape_cast %19 : vector<1x16x128xf32> to vector<16x128xf32>
    %21 = vector.shape_cast %18 : vector<16x128xf32> to vector<1x16x128xf32>
    tpu.vector_store %arg3[%c2_16, %c0_17, %c0_18], %21 {strides = array<i32>} : memref<4x16x128xf32, #tpu.memory_space<vmem>>, vector<1x16x128xf32>,
    %c3 = arith.constant 3 : index
    %c0_19 = arith.constant 0 : index
    %c0_20 = arith.constant 0 : index
    %22 = vector.load %arg2[%c3, %c0_19, %c0_20] : memref<4x16x128xf32, #tpu.memory_space<vmem>>, vector<1x16x128xf32>
    %23 = vector.shape_cast %22 : vector<1x16x128xf32> to vector<16x128xf32>
    %24 = arith.truncf %23 : vector<16x128xf32> to vector<16x128xbf16>
    %cst_21 = arith.constant dense<0.000000e+00> : vector<16x128xf32>
    %25 = tpu.matmul %0, %24, %cst_21 {dimension_numbers = #tpu.dot_dimension_numbers<[1], [0], [0], [1], [0, 0, 1, 1], [], []>} : vector<16x16xbf16>, vector<16x128xbf16>, vector<16x128xf32> -> vector<16x128xf32>
    %c3_22 = arith.constant 3 : index
    %c0_23 = arith.constant 0 : index
    %c0_24 = arith.constant 0 : index
    %26 = vector.load %arg3[%c3_22, %c0_23, %c0_24] : memref<4x16x128xf32, #tpu.memory_space<vmem>>, vector<1x16x128xf32>
    %27 = vector.shape_cast %26 : vector<1x16x128xf32> to vector<16x128xf32>
    %28 = vector.shape_cast %25 : vector<16x128xf32> to vector<1x16x128xf32>
    tpu.vector_store %arg3[%c3_22, %c0_23, %c0_24], %28 {strides = array<i32>} : memref<4x16x128xf32, #tpu.memory_space<vmem>>, vector<1x16x128xf32>,
    return
  }
  func.func @transform_0(%arg0: i32) -> (i32, i32) {
    %c0_i32 = arith.constant 0 : i32
    %c0_i32_0 = arith.constant 0 : i32
    %c0_i32_1 = arith.constant 0 : i32
    return %c0_i32, %c0_i32_0 : i32, i32
  }
  func.func @transform_1(%arg0: i32) -> (i32, i32, i32) {
    %c0_i32 = arith.constant 0 : i32
    %c0_i32_0 = arith.constant 0 : i32
    %c0_i32_1 = arith.constant 0 : i32
    return %arg0, %c0_i32, %c0_i32_0 : i32, i32, i32
  }
  func.func @transform_2(%arg0: i32) -> (i32, i32, i32) {
    %c0_i32 = arith.constant 0 : i32
    %c0_i32_0 = arith.constant 0 : i32
    %c0_i32_1 = arith.constant 0 : i32
    return %arg0, %c0_i32, %c0_i32_0 : i32, i32, i32
  }
}

</mosaic_0001>

<bundles_post_ra>
// kernel: spec_warper_forward.1
= control target key start
LH: loop header
LB: loop body
LE: loop exit
PB: predicated region body
PF: predicated region fallthrough
CT: control target
= control target key end

     0   :  { %7 = vsyncpa [#allocation3], 0  ;;  %s731_s0 = inlined_call_operand.vmem [shape: bf16[16,16], index: 0, kind: input, shape index: {}]   ;;  %s732_s1 = inlined_call_operand.vmem [shape: f32[8,16,128], index: 1, kind: input, shape index: {}]   ;;  %s733_s2 = inlined_call_operand.hbm [shape: f32[8,16,128], index: 2, kind: output, shape index: {}]  }
   0x1   :  { %9 = vsyncpa [#allocation3 + $0x1], 0  ;;  %s619_s9 = smov 0   ;;  %s621_s10 = smov 0  }
   0x2   :  { %s623_s11 = smov 0   ;;  %s625_s12 = smov 0  }
   0x3 LB: > { %s640_s13 = sadd.s32 4294967295, %s597_s12   ;;  %s427_s14 = sadd.s32 4294967294, %s597_s12   ;;  %s597_s12 = sphi %s625_s12, %s739_s12   ;;  %s593_s11 = sphi %s623_s11, %s738_s11   ;;  %s589_s10 = sphi %s621_s10, %s737_s10   ;;  %s585_s9 = sphi %s619_s9, %s736_s9  }
   0x4   : > { %s644_s15 = sadd.s32 1, %s597_s12   ;;  %s69_s16 = sadd.s32 1, %s593_s11 }
   0x5   : > { %s66_s17 = ssub.s32 %s597_s12, %s644_s15  ;;  %p79_p0 = scmp.ne.s32.totalorder %s593_s11, %s589_s10 }
   0x6   : > { %p67_p1 = scmp.eq.s32.totalorder %s66_s17, 0  ;;  %p80_p2 = scmp.eq.s32.totalorder %s640_s13, 1 }
   0x7   : > { %p85_p3 = scmp.ne.s32.totalorder %s589_s10, %s585_s9  ;;  %p86_p4 = scmp.eq.s32.totalorder %s427_s14, 1 }
   0x8   : > { %s655_s18 = scalar_select %p67_p1, %s593_s11, %s69_s16  }
   0x9   : > { %p657_p5 = por %p80_p2, %p79_p0  ;;  %p661_p6 = por %p86_p4, %p85_p3 }
   0xa   : > { %p430_p7 = scmp.ge.s32.totalorder %s597_s12, 1  ;;  %p117_p8 = scmp.lt.s32.totalorder %s597_s12, 3 }
   0xc   : > { %p118_p9 = pnand %p430_p7, %p117_p8 }
   0xd   : > { %s432_s21 = sshll.u32 (!%p118_p9), %s640_s13, 2  ;;  %s137_s28 = sand.u32 (!%p118_p9), 1, %s589_s10  }
   0xe   : > { %121 = sbr.rel (%p118_p9) target bundleno = 249 (0xf9), region = 28  ;;  %p141_p10 = scmp.lt.s32.totalorder (!%p118_p9), %s432_s21, 7 }
   0xf   : > { %s431_s29 = sshll.u32 (!%p118_p9), %s137_s28, 6  ;;  %s460_s4 = sshll.u32 (!%p118_p9), %s640_s13, 10 }
  0x10   : > { %s139_s30 = scalar_lea.vmem (!%p118_p9), [#allocation2], %s431_s29  ;;  %s687_s7 = scalar_lea.hbm (!%p118_p9), %s733_s2, %s460_s4 }
  0x11   : > { %s365_s3 = sshll.u32 (!%p118_p9), %s139_s30, 4  ;;  %s691_s8 = scalar_lea.sflag (!%p118_p9), [#allocation3], %s137_s28  ;;  %s682_s3 = int_to_ptr.vmem [resolvable:$true] %s365_s3 }
  0x12   : > { %s537_s13 = scalar_lea.vmem (!%p118_p9), %s682_s3, 1024  ;;  %s601_s14 = smov (!%p118_p9), [#allocation2]  }
  0x13   : > { %v599_v0 = vmov 0.0   ;;  %vm600_vm0 = vmmov 0   ;;  %s741_s21 = smov (!%p141_p10, %s432_s21), 7  ;;  %v536_v9 = vld [vmem:[%s731_s0] sm:$0xff]   ;;  %vm159_vm1 = vcmask 130048   ;;  %p538_p11 = scmp.ne.s32.totalorder %s682_s3, %s537_s13 }
  0x14   : > { %469 = vmatprep.subr.bf16.mxu0 %v599_v0  ;;  %475 = vmatprep.subr.bf16.mxu1 %v599_v0  ;;  %s458_s22 = sshll.u32 %s741_s21, 4  ;;  %s541_s16 = sshll.u32 %s601_s14, 4  ;;  %s542_s16 = int_to_ptr.vmem [resolvable:$false] %s541_s16 }
  0x15   : > { %471 = vmatprep.mubr.msk.bf16.mxu0 %vm600_vm0, %v599_v0  ;;  %477 = vmatprep.mubr.msk.bf16.mxu1 %vm600_vm0, %v599_v0  ;;  %s145_s25 = scalar_lea.vmem %s732_s1, %s458_s22  ;;  %p539_p12 = pnand %p538_p11, %p657_p5 }
  0x16   : > { %v151_v1 = vld [vmem:[%s145_s25] sm:$0xff]  ;;  %v152_v2 = vld [vmem:[%s145_s25 + $0x8] sm:$0xff]  ;;  %v437_v3 = vld [vmem:[%s145_s25 + $0x10] sm:$0xff]  ;;  %s543_s17 = scalar_lea.vmem %s542_s16, 2048  ;;  %p544_p0 = scmp.lt.s32.totalorder %s682_s3, %s542_s16 }
  0x17   : > { %v153_v4 = vpack.c.bf16 %v152_v2, %v151_v1  ;;  %v438_v5 = vld [vmem:[%s145_s25 + $0x18] sm:$0xff]  ;;  %v442_v6 = vld [vmem:[%s145_s25 + $0x20] sm:$0xff]  ;;  %v443_v7 = vld [vmem:[%s145_s25 + $0x28] sm:$0xff]  ;;  %p540_p13 = pneg %p539_p12  ;;  %p545_p1 = scmp.lt.s32.totalorder %s543_s17, %s537_s13 }
  0x18   : > { %v209_v8 = vpack.c.bf16 %v438_v5, %v437_v3  ;;  %v447_v10 = vld [vmem:[%s145_s25 + $0x30] sm:$0xff]  ;;  %v448_v11 = vld [vmem:[%s145_s25 + $0x38] sm:$0xff]  ;;  %v257_v12 = vpack.c.bf16 %v443_v7, %v442_v6 }
  0x19   : > { %470 = vmatpush3.bf16.msra.mxu0 %v153_v4  ;;  %v305_v13 = vpack.c.bf16 %v448_v11, %v447_v10  ;;  %p546_p2 = por %p545_p1, %p544_p0 }
  0x1a   : > { %476 = vmatpush3.bf16.msra.mxu1 %v209_v8  ;;  %481 = vmatprep.subr.bf16.mxu0 %v599_v0 }
  0x1b   : > { %487 = vmatprep.subr.bf16.mxu1 %v599_v0  ;;  %p547_p3 = pnand %p546_p2, %p540_p13 }
  0x1c   : > { %472 = vmatmul.mubr.msk.bf16.vlgmr.msra.gmra.mxu0 %vm159_vm1, %v536_v9 }
  0x1d   : > { %478 = vmatmul.mubr.msk.bf16.vlgmr.msra.gmra.mxu1 %vm159_vm1, %v536_v9  ;;  %482 = vmatpush3.bf16.msra.mxu0 %v257_v12 }
  0x1e   : > { %488 = vmatpush3.bf16.msra.mxu1 %v305_v13  ;;  %483 = vmatprep.mubr.msk.bf16.mxu0 %vm600_vm0, %v599_v0 }
  0x1f   : > { %489 = vmatprep.mubr.msk.bf16.mxu1 %vm600_vm0, %v599_v0 }
  0x24   : > { %484 = vmatmul.mubr.msk.bf16.vlgmr.msra.gmra.mxu0 %vm159_vm1, %v536_v9 }
  0x25   : > { %490 = vmatmul.mubr.msk.bf16.vlgmr.msra.gmra.mxu1 %vm159_vm1, %v536_v9 }
  0xdc   : > { %v197_v14 = vpop.f32.mrf.mxu0 }
  0xdd   : > { %204 = vst [vmem:[%s139_s30] sm:$0xff] %v197_v14  ;;  %v244_v15 = vpop.f32.mrf.mxu1 }
  0xde   : > { %440 = vst [vmem:[%s139_s30 + $0x10] sm:$0xff] %v244_v15  ;;  %v473_v16 = vpop.f32.mrf.mxu0 }
  0xdf   : > { %v479_v17 = vpop.f32.mrf.mxu1 }
  0xe0   : > { %v200_v18 = vpop.f32.mrf.mxu0 }
  0xe1   : > { %205 = vst [vmem:[%s139_s30 + $0x8] sm:$0xff] %v200_v18  ;;  %v247_v19 = vpop.f32.mrf.mxu1 }
  0xe2   : > { %441 = vst [vmem:[%s139_s30 + $0x18] sm:$0xff] %v247_v19  ;;  %v474_v20 = vpop.f32.mrf.mxu0 }
  0xe3   : > { %v480_v21 = vpop.f32.mrf.mxu1 }
  0xe4   : > { %v292_v22 = vpop.f32.mrf.mxu0 }
  0xe5   : > { %445 = vst [vmem:[%s139_s30 + $0x20] sm:$0xff] %v292_v22  ;;  %v340_v23 = vpop.f32.mrf.mxu1 }
  0xe6   : > { %450 = vst [vmem:[%s139_s30 + $0x30] sm:$0xff] %v340_v23  ;;  %v485_v24 = vpop.f32.mrf.mxu0 }
  0xe7   : > { %v491_v25 = vpop.f32.mrf.mxu1 }
  0xe8   : > { %v295_v26 = vpop.f32.mrf.mxu0 }
  0xe9   : > { %446 = vst [vmem:[%s139_s30 + $0x28] sm:$0xff] %v295_v26  ;;  %v343_v27 = vpop.f32.mrf.mxu1 }
  0xea   : > { %451 = vst [vmem:[%s139_s30 + $0x38] sm:$0xff] %v343_v27  ;;  %v486_v28 = vpop.f32.mrf.mxu0 }
  0xeb   : > { %v492_v29 = vpop.f32.mrf.mxu1 }
  0xec   : > { %550 = shalt.err (!%p547_p3)
}
  0xed   : > { %s551_s21 = scalar_lea.hbm %s687_s7, 1024  ;;  %s555_s24 = scalar_lea.hbm %s733_s2, 2048 }
  0xee   : > { %p552_p4 = scmp.ne.s32.totalorder %s687_s7, %s551_s21  ;;  %p556_p9 = scmp.lt.s32.totalorder %s687_s7, %s733_s2 }
  0xef   : > { %p557_p10 = scmp.lt.s32.totalorder %s555_s24, %s551_s21 }
  0xf0   : > { %p553_p7 = pnand %p552_p4, %p657_p5 }
  0xf1   : > { %p558_p11 = por %p557_p10, %p556_p9 }
  0xf2   : > { %p554_p8 = pneg %p553_p7 }
  0xf4   : > { %p559_p12 = pnand %p558_p11, %p554_p8 }
  0xf6   : > { %562 = shalt.err (!%p559_p12)
}
  0xf7   : > { %s602_s27 = smov 128   ;;  %s603_s28 = smov 8  }
  0xf8   : > { %493 = dma.vmem_to_hbm [thread:$0]  (%p657_p5), %s682_s3, 1024, %s687_s7, %s691_s8, %s602_s27, %s602_s27, %s603_s28  }
  0xf9 PF: > { %p499_p13 = scmp.ge.s32.totalorder %s597_s12, 2  ;;  %s380_s29 = sand.u32 1, %s585_s9  }
  0xfa   : > { %s381_s30 = scalar_lea.sflag [#allocation3], %s380_s29 }
  0xfb   : > { %p496_p0 = pnand %p499_p13, %p661_p6 }
  0xfd   : > { %p497_p1 = pneg %p496_p0 }
  0xff   : > { %580 = dma.done.wait (%p497_p1), %s381_s30, 1024  }
 0x100   : > { %582 = vsyncadd (%p497_p1), %s381_s30, 4294966272  ;;  %p12_p2 = scmp.ge.s32.totalorder %s644_s15, 4   ;;  %s736_s9 = smov %s589_s10 }
 0x101   : > { %s737_s10 = smov %s593_s11  ;;  %s738_s11 = smov %s655_s18 }
 0x102   : > { %s739_s12 = smov %s644_s15  ;;  %14 = sbr.rel (!%p12_p2) target bundleno = 3 (0x3), region = 69 }
 0x107   :  { %386 = vsyncpa [#allocation3], 1 }
 0x108   :  { %388 = vsyncpa [#allocation3 + $0x1], 1 }

</bundles_post_ra>
